<compile_context>
chip_gen: v7x
topology: tpu7x:2x2x1
jax: 0.10.0
libtpu: 0.0.40
codegen_flags: <defaults>
</compile_context>

<pallas_src>
import jax
import jax.numpy as jnp
from jax.experimental import pallas as pl
from jax.experimental.pallas import tpu as pltpu

NEG_SLOPE = 0.01   # torch.nn.LeakyReLU default negative_slope
LANE = 128         # TPU lane width
SUBLANE = 16       # bf16 sublane packing (safe for f32 too)
MAX_TILE = 4096    # max batch-tile rows per grid step


def _leaky_relu(x):
    return jnp.where(x > 0, x, NEG_SLOPE * x)


def _round_up(n, m):
    return ((n + m - 1) // m) * m


def _cdiv(a, b):
    return (a + b - 1) // b


def augmented_mlp_kernel(x_ref, w1_ref, b1_ref, w2_ref, b2_ref,
                         w34_ref, b34_ref, o_ref):
    """One batch-tile of the fused augmented-MLP forward (3 MXU matmuls).

    Matmul operands are in compute dtype (bf16 by default); accumulation and
    bias/activation math are f32.  Output store is lane-dense (128-wide).
    """
    x = x_ref[...]                                              # (TB, in) compute dtype

    # hidden layer 1: Linear -> LeakyReLU -> Dropout(eval: identity)
    h = jnp.dot(x, w1_ref[...], preferred_element_type=jnp.float32) + b1_ref[...]
    h = _leaky_relu(h).astype(w2_ref.dtype)

    # hidden layer 2: Linear -> LeakyReLU -> Dropout(eval: identity)
    h = jnp.dot(h, w2_ref[...], preferred_element_type=jnp.float32) + b2_ref[...]
    h = _leaky_relu(h).astype(w34_ref.dtype)

    # folded (TorchNet output @ augmented_output): one lane-dense matmul
    y = jnp.dot(h, w34_ref[...], preferred_element_type=jnp.float32) + b34_ref[...]
    o_ref[...] = y.astype(o_ref.dtype)                          # unmasked 128-lane vst


def augmented_torch_net_forward(x, params, n_augment, *, batch_tile=None,
                                compute_dtype=jnp.bfloat16, out_dtype=None,
                                return_padded=False):
    """Fold/pad parameters (wrapper-side algebra), then run one fused Pallas kernel.

    compute_dtype: MXU operand dtype (bf16 default; pass jnp.float32 for exactness).
    out_dtype:     HBM output dtype (defaults to x.dtype).
    return_padded: if True, return the lane-dense (Bp, 128) slab and skip the
                   post-kernel slice copy (consumer takes padding).
    """
    B, in_features = x.shape
    w1, b1, w2, b2, w3, b3, w4, b4 = params
    out_features = w4.shape[1]
    out_dtype = x.dtype if out_dtype is None else out_dtype

    # --- parameter algebra (wrapper-side) --------------------------------------
    # Drop the zero-augmented input columns: zeros @ w1[in:, :] == 0 (exact).
    w1_eff = w1[:in_features, :]                                # (in, H1)
    # Fold the two trailing linear layers (no activation between them).
    w34 = w3 @ w4                                               # (H2, out)
    b34 = b3 @ w4 + b4                                          # (1, out)

    H1 = w1_eff.shape[1]
    H2 = w2.shape[1]
    H1p = _round_up(H1, LANE)
    H2p = _round_up(H2, LANE)
    OUTp = _round_up(out_features, LANE)

    # Lane-dense zero padding (exact: pads are 0, LeakyReLU(0)=0, 0-rows kill 0-acts).
    # Weights cast to compute dtype (bf16) for the MXU; biases stay f32 (added to
    # the f32 accumulator).
    w1_p = jnp.pad(w1_eff, ((0, 0), (0, H1p - H1))).astype(compute_dtype)
    b1_p = jnp.pad(b1, ((0, 0), (0, H1p - H1))).astype(jnp.float32)
    w2_p = jnp.pad(w2, ((0, H1p - H1), (0, H2p - H2))).astype(compute_dtype)
    b2_p = jnp.pad(b2, ((0, 0), (0, H2p - H2))).astype(jnp.float32)
    w34_p = jnp.pad(w34, ((0, H2p - H2), (0, OUTp - out_features))).astype(compute_dtype)
    b34_p = jnp.pad(b34, ((0, 0), (0, OUTp - out_features))).astype(jnp.float32)

    # --- batch tiling (balanced, v7x-aware) -------------------------------------
    if batch_tile is None:
        if B <= 1024:
            n_steps = 1                       # fixed call overhead dominates anyway
        else:
            n_steps = max(2, _cdiv(B, MAX_TILE))
            if n_steps % 2:                   # even step count -> both v7x TCs busy
                n_steps += 1
        batch_tile = _round_up(_cdiv(B, n_steps), SUBLANE)
    else:
        batch_tile = _round_up(batch_tile, SUBLANE)

    Bp = _round_up(B, batch_tile)
    x_c = x.astype(compute_dtype)
    if Bp != B:
        x_c = jnp.pad(x_c, ((0, Bp - B), (0, 0)))
    grid = (Bp // batch_tile,)

    def full_spec(a):
        # Grid-invariant resident parameter (tiny; index_map always (0, 0)).
        return pl.BlockSpec(a.shape, lambda i: (0, 0))

    # --- cost estimate from REAL (unpadded) dims --------------------------------
    flops = 2 * B * (in_features * H1 + H1 * H2 + H2 * out_features)
    elem_in = jnp.dtype(compute_dtype).itemsize
    elem_out = jnp.dtype(out_dtype).itemsize
    bytes_accessed = (
        B * in_features * elem_in + B * out_features * elem_out
        + (in_features * H1 + H1 + H1 * H2 + H2 + H2 * out_features + out_features)
        * elem_in)

    # --- explicit scoped-VMEM budget (keeps large tiles portable to v5e) --------
    weight_bytes = sum(int(a.size) * a.dtype.itemsize
                       for a in (w1_p, b1_p, w2_p, b2_p, w34_p, b34_p))
    io_bytes = 2 * batch_tile * (in_features * elem_in + OUTp * elem_out)  # dbl-buffered
    act_bytes = 3 * batch_tile * max(H1p, H2p, OUTp) * 4                   # f32 temps
    vmem_limit = int(min(100 * 2**20, max(8 * 2**20, 2 * (weight_bytes + io_bytes + act_bytes))))

    out_padded = pl.pallas_call(
        augmented_mlp_kernel,
        out_shape=jax.ShapeDtypeStruct((Bp, OUTp), out_dtype),
        grid_spec=pltpu.PrefetchScalarGridSpec(
            num_scalar_prefetch=0,
            grid=grid,
            in_specs=[
                pl.BlockSpec((batch_tile, in_features), lambda i: (i, 0)),
                full_spec(w1_p), full_spec(b1_p),
                full_spec(w2_p), full_spec(b2_p),
                full_spec(w34_p), full_spec(b34_p),
            ],
            out_specs=pl.BlockSpec((batch_tile, OUTp), lambda i: (i, 0)),
        ),
        compiler_params=pltpu.CompilerParams(
            dimension_semantics=("parallel",),
            vmem_limit_bytes=vmem_limit),
        cost_estimate=pl.CostEstimate(
            flops=int(flops), transcendentals=0,
            bytes_accessed=int(bytes_accessed)),
    )(x_c, w1_p, b1_p, w2_p, b2_p, w34_p, b34_p)

    if return_padded:
        # Consumer accepts the lane-dense slab; avoids the slice copy entirely.
        return out_padded
    # Slice off batch/feature padding (layout plumbing only).
    return out_padded[:B, :out_features]


def init_params(key, in_features, out_features, hidden, n_augment):
    """Deterministic PyTorch-Linear-style init (uniform +/- 1/sqrt(fan_in)).

    Layer stack (weights stored transposed, shape (fan_in, fan_out)):
      hidden layers over (in+n_aug) -> hidden[0] -> ... -> hidden[-1]
      TorchNet output: hidden[-1] -> (out+n_aug)
      augmented_output: (out+n_aug) -> out_features
    """
    in_aug = in_features + n_augment
    out_aug = out_features + n_augment
    dims = [in_aug] + list(hidden) + [out_aug]
    layer_dims = list(zip(dims[:-1], dims[1:])) + [(out_aug, out_features)]

    params = []
    for fan_in, fan_out in layer_dims:
        key, kw, kb = jax.random.split(key, 3)
        bound = 1.0 / float(fan_in) ** 0.5
        W = jax.random.uniform(kw, (fan_in, fan_out), jnp.float32, -bound, bound)
        b = jax.random.uniform(kb, (1, fan_out), jnp.float32, -bound, bound)
        params += [W, b]
    return params


def ref_forward(x, params, n_augment):
    """Pure-JAX f32 reference of the same forward pass (eval mode)."""
    x_aug = jnp.concatenate(
        [x, jnp.zeros((x.shape[0], n_augment), x.dtype)], axis=1)
    w1, b1, w2, b2, w3, b3, w4, b4 = params
    h = _leaky_relu(x_aug @ w1 + b1)
    h = _leaky_relu(h @ w2 + b2)
    y_aug = h @ w3 + b3
    return y_aug @ w4 + b4


if __name__ == "__main__":
    # AugmentedTorchNet(in_features=4, out_features=4, hidden=[32, 32],
    #                   activation=['LeakyReLU'], dropout=[0.2],
    #                   n_augment=2, output_bias=True)   -- eval mode
    in_features, out_features = 4, 4
    hidden = [32, 32]
    n_augment = 2
    batch = 16

    key = jax.random.PRNGKey(0)
    key, kx = jax.random.split(key)
    x = jax.random.normal(kx, (batch, in_features), jnp.float32)

    params = init_params(key, in_features, out_features, hidden, n_augment)

    ref = jax.block_until_ready(ref_forward(x, params, n_augment))

    # Default path: bf16 MXU operands, f32 accumulation / output.
    out = augmented_torch_net_forward(x, params, n_augment)
    out = jax.block_until_ready(out)
    assert out.shape == (batch, out_features)
    assert jnp.allclose(out, ref, atol=5e-2, rtol=5e-2), \
        "bf16-operand kernel mismatch vs f32 JAX reference"

    # f32-operand path (exact-to-fp-rounding check against the reference).
    out_f32 = augmented_torch_net_forward(x, params, n_augment,
                                          compute_dtype=jnp.float32)
    out_f32 = jax.block_until_ready(out_f32)
    assert jnp.allclose(out_f32, ref, atol=1e-5, rtol=1e-5), \
        "f32-operand kernel mismatch vs f32 JAX reference"

    print("KERNEL_OK")
</pallas_src>

<mosaic_0001>
module attributes {stable_mosaic.version = 11 : i64} {
  func.func @augmented_mlp_kernel(%arg0: i32, %arg1: memref<16x4xbf16, #tpu.memory_space<vmem>>, %arg2: memref<4x128xbf16, #tpu.memory_space<vmem>>, %arg3: memref<1x128xf32, #tpu.memory_space<vmem>>, %arg4: memref<128x128xbf16, #tpu.memory_space<vmem>>, %arg5: memref<1x128xf32, #tpu.memory_space<vmem>>, %arg6: memref<128x128xbf16, #tpu.memory_space<vmem>>, %arg7: memref<1x128xf32, #tpu.memory_space<vmem>>, %arg8: memref<16x128xf32, #tpu.memory_space<vmem>>) attributes {dimension_semantics = [#tpu.dimension_semantics<parallel>], iteration_bounds = array<i64: 1>, scalar_prefetch = 0 : i64, scratch_operands = 0 : i64, tpu.core_type = #tpu.core_type<tc>, window_params = [{transform_indices = @transform_0, window_bounds = array<i64: 16, 4>}, {pipeline_mode = #tpu.pipeline_mode<synchronous>, transform_indices = @transform_1, window_bounds = array<i64: 4, 128>}, {pipeline_mode = #tpu.pipeline_mode<synchronous>, transform_indices = @transform_2, window_bounds = array<i64: 1, 128>}, {pipeline_mode = #tpu.pipeline_mode<synchronous>, transform_indices = @transform_3, window_bounds = array<i64: 128, 128>}, {pipeline_mode = #tpu.pipeline_mode<synchronous>, transform_indices = @transform_4, window_bounds = array<i64: 1, 128>}, {pipeline_mode = #tpu.pipeline_mode<synchronous>, transform_indices = @transform_5, window_bounds = array<i64: 128, 128>}, {pipeline_mode = #tpu.pipeline_mode<synchronous>, transform_indices = @transform_6, window_bounds = array<i64: 1, 128>}, {transform_indices = @transform_7, window_bounds = array<i64: 16, 128>}]} {
    %c0 = arith.constant 0 : index
    %c0_0 = arith.constant 0 : index
    %0 = vector.load %arg1[%c0, %c0_0] : memref<16x4xbf16, #tpu.memory_space<vmem>>, vector<16x4xbf16>
    %c0_1 = arith.constant 0 : index
    %c0_2 = arith.constant 0 : index
    %1 = vector.load %arg2[%c0_1, %c0_2] : memref<4x128xbf16, #tpu.memory_space<vmem>>, vector<4x128xbf16>
    %cst = arith.constant dense<0.000000e+00> : vector<16x128xf32>
    %2 = tpu.matmul %0, %1, %cst {dimension_numbers = #tpu.dot_dimension_numbers<[1], [0], [0], [1], [0, 0, 1, 1], [], []>} : vector<16x4xbf16>, vector<4x128xbf16>, vector<16x128xf32> -> vector<16x128xf32>
    %c0_3 = arith.constant 0 : index
    %c0_4 = arith.constant 0 : index
    %3 = vector.load %arg3[%c0_3, %c0_4] : memref<1x128xf32, #tpu.memory_space<vmem>>, vector<1x128xf32>
    %4 = vector.broadcast %3 : vector<1x128xf32> to vector<16x128xf32>
    %5 = arith.addf %2, %4 : vector<16x128xf32>
    %cst_5 = arith.constant 0.000000e+00 : f32
    %6 = vector.broadcast %cst_5 : f32 to vector<16x128xf32>
    %7 = arith.cmpf ogt, %5, %6 : vector<16x128xf32>
    %cst_6 = arith.constant 0.00999999977 : f32
    %8 = vector.broadcast %cst_6 : f32 to vector<16x128xf32>
    %9 = arith.mulf %8, %5 : vector<16x128xf32>
    %10 = arith.select %7, %5, %9 : vector<16x128xi1>, vector<16x128xf32>
    %11 = arith.truncf %10 : vector<16x128xf32> to vector<16x128xbf16>
    %c0_7 = arith.constant 0 : index
    %c0_8 = arith.constant 0 : index
    %12 = vector.load %arg4[%c0_7, %c0_8] : memref<128x128xbf16, #tpu.memory_space<vmem>>, vector<128x128xbf16>
    %cst_9 = arith.constant dense<0.000000e+00> : vector<16x128xf32>
    %13 = tpu.matmul %11, %12, %cst_9 {dimension_numbers = #tpu.dot_dimension_numbers<[1], [0], [0], [1], [0, 0, 1, 1], [], []>} : vector<16x128xbf16>, vector<128x128xbf16>, vector<16x128xf32> -> vector<16x128xf32>
    %c0_10 = arith.constant 0 : index
    %c0_11 = arith.constant 0 : index
    %14 = vector.load %arg5[%c0_10, %c0_11] : memref<1x128xf32, #tpu.memory_space<vmem>>, vector<1x128xf32>
    %15 = vector.broadcast %14 : vector<1x128xf32> to vector<16x128xf32>
    %16 = arith.addf %13, %15 : vector<16x128xf32>
    %cst_12 = arith.constant 0.000000e+00 : f32
    %17 = vector.broadcast %cst_12 : f32 to vector<16x128xf32>
    %18 = arith.cmpf ogt, %16, %17 : vector<16x128xf32>
    %cst_13 = arith.constant 0.00999999977 : f32
    %19 = vector.broadcast %cst_13 : f32 to vector<16x128xf32>
    %20 = arith.mulf %19, %16 : vector<16x128xf32>
    %21 = arith.select %18, %16, %20 : vector<16x128xi1>, vector<16x128xf32>
    %22 = arith.truncf %21 : vector<16x128xf32> to vector<16x128xbf16>
    %c0_14 = arith.constant 0 : index
    %c0_15 = arith.constant 0 : index
    %23 = vector.load %arg6[%c0_14, %c0_15] : memref<128x128xbf16, #tpu.memory_space<vmem>>, vector<128x128xbf16>
    %cst_16 = arith.constant dense<0.000000e+00> : vector<16x128xf32>
    %24 = tpu.matmul %22, %23, %cst_16 {dimension_numbers = #tpu.dot_dimension_numbers<[1], [0], [0], [1], [0, 0, 1, 1], [], []>} : vector<16x128xbf16>, vector<128x128xbf16>, vector<16x128xf32> -> vector<16x128xf32>
    %c0_17 = arith.constant 0 : index
    %c0_18 = arith.constant 0 : index
    %25 = vector.load %arg7[%c0_17, %c0_18] : memref<1x128xf32, #tpu.memory_space<vmem>>, vector<1x128xf32>
    %26 = vector.broadcast %25 : vector<1x128xf32> to vector<16x128xf32>
    %27 = arith.addf %24, %26 : vector<16x128xf32>
    %c0_19 = arith.constant 0 : index
    %c0_20 = arith.constant 0 : index
    %28 = vector.load %arg8[%c0_19, %c0_20] : memref<16x128xf32, #tpu.memory_space<vmem>>, vector<16x128xf32>
    tpu.vector_store %arg8[%c0_19, %c0_20], %27 {strides = array<i32>} : memref<16x128xf32, #tpu.memory_space<vmem>>, vector<16x128xf32>,
    return
  }
  func.func @transform_0(%arg0: i32) -> (i32, i32) {
    %c0_i32 = arith.constant 0 : i32
    %c0_i32_0 = arith.constant 0 : i32
    return %arg0, %c0_i32 : i32, i32
  }
  func.func @transform_1(%arg0: i32) -> (i32, i32) {
    %c0_i32 = arith.constant 0 : i32
    %c0_i32_0 = arith.constant 0 : i32
    %c0_i32_1 = arith.constant 0 : i32
    return %c0_i32, %c0_i32_0 : i32, i32
  }
  func.func @transform_2(%arg0: i32) -> (i32, i32) {
    %c0_i32 = arith.constant 0 : i32
    %c0_i32_0 = arith.constant 0 : i32
    %c0_i32_1 = arith.constant 0 : i32
    return %c0_i32, %c0_i32_0 : i32, i32
  }
  func.func @transform_3(%arg0: i32) -> (i32, i32) {
    %c0_i32 = arith.constant 0 : i32
    %c0_i32_0 = arith.constant 0 : i32
    %c0_i32_1 = arith.constant 0 : i32
    return %c0_i32, %c0_i32_0 : i32, i32
  }
  func.func @transform_4(%arg0: i32) -> (i32, i32) {
    %c0_i32 = arith.constant 0 : i32
    %c0_i32_0 = arith.constant 0 : i32
    %c0_i32_1 = arith.constant 0 : i32
    return %c0_i32, %c0_i32_0 : i32, i32
  }
  func.func @transform_5(%arg0: i32) -> (i32, i32) {
    %c0_i32 = arith.constant 0 : i32
    %c0_i32_0 = arith.constant 0 : i32
    %c0_i32_1 = arith.constant 0 : i32
    return %c0_i32, %c0_i32_0 : i32, i32
  }
  func.func @transform_6(%arg0: i32) -> (i32, i32) {
    %c0_i32 = arith.constant 0 : i32
    %c0_i32_0 = arith.constant 0 : i32
    %c0_i32_1 = arith.constant 0 : i32
    return %c0_i32, %c0_i32_0 : i32, i32
  }
  func.func @transform_7(%arg0: i32) -> (i32, i32) {
    %c0_i32 = arith.constant 0 : i32
    %c0_i32_0 = arith.constant 0 : i32
    return %arg0, %c0_i32 : i32, i32
  }
}

</mosaic_0001>

<bundles_post_ra>
// kernel: tpu_custom_call.1
= control target key start
LH: loop header
LB: loop body
LE: loop exit
PB: predicated region body
PF: predicated region fallthrough
CT: control target
= control target key end

     0   :  { %12 = vsyncpa [#allocation3], 0  ;;  %s686_s0 = inlined_call_operand.vmem [shape: bf16[16,4], index: 0, kind: input, shape index: {}]   ;;  %s687_s1 = inlined_call_operand.vmem [shape: bf16[4,128], index: 1, kind: input, shape index: {}]   ;;  %s688_s2 = inlined_call_operand.vmem [shape: f32[1,128], index: 2, kind: input, shape index: {}]   ;;  %s689_s3 = inlined_call_operand.hbm [shape: bf16[128,128], index: 3, kind: input, shape index: {}]   ;;  %s690_s4 = inlined_call_operand.vmem [shape: f32[1,128], index: 4, kind: input, shape index: {}]   ;;  %s691_s5 = inlined_call_operand.hbm [shape: bf16[128,128], index: 5, kind: input, shape index: {}]   ;;  %s692_s6 = inlined_call_operand.vmem [shape: f32[1,128], index: 6, kind: input, shape index: {}]   ;;  %s693_s7 = inlined_call_operand.hbm [shape: f32[16,128], index: 7, kind: output, shape index: {}]  }
   0x1   :  { %13 = vsyncpa [#allocation6], 0 }
   0x2   :  { %14 = vsyncpa [#allocation4], 0  ;;  %s563_s24 = smov [#allocation2]   ;;  %s491_s28 = scalar_lea.hbm %s689_s3, 1024 }
   0x3   :  { %s26_s25 = sshll.u32 %s563_s24, 4  ;;  %p492_p0 = scmp.ne.s32.totalorder %s689_s3, %s491_s28  ;;  %s27_s25 = int_to_ptr.vmem [resolvable:$true] %s26_s25 }
   0x4   :  { %p495_p1 = scmp.lt.u32.totalorder %s491_s28, %s689_s3 }
   0x6   :  { %p497_p2 = pnand %p495_p1, %p492_p0 }
   0x8   :  { %500 = shalt.err (!%p497_p2)
}
   0x9   :  { %s501_s10 = scalar_lea.vmem %s27_s25, 1024  ;;  %p506_p4 = scmp.lt.s32.totalorder %s27_s25, %s27_s25 }
   0xa   :  { %p502_p3 = scmp.ne.s32.totalorder %s27_s25, %s501_s10  ;;  %p507_p5 = scmp.lt.s32.totalorder %s501_s10, %s501_s10 }
   0xc   :  { %p508_p6 = por %p507_p5, %p506_p4 }
   0xe   :  { %p509_p7 = pnand %p508_p6, %p502_p3 }
  0x10   :  { %512 = shalt.err (!%p509_p7)
}
  0x11   :  { %s564_s11 = smov 64   ;;  %s565_s12 = smov 4  }
  0x12   :  { %32 = dma.hbm_to_vmem [thread:$0]  %s689_s3, 1024, %s27_s25, [#allocation3], %s564_s11, %s564_s11, %s565_s12  }
  0x13   :  { %s566_s15 = smov [#allocation5]   ;;  %s513_s19 = scalar_lea.hbm %s691_s5, 1024 }
  0x14   :  { %s40_s16 = sshll.u32 %s566_s15, 4  ;;  %p514_p8 = scmp.ne.s32.totalorder %s691_s5, %s513_s19  ;;  %s41_s16 = int_to_ptr.vmem [resolvable:$true] %s40_s16 }
  0x15   :  { %p517_p9 = scmp.lt.u32.totalorder %s513_s19, %s691_s5 }
  0x17   :  { %p519_p10 = pnand %p517_p9, %p514_p8 }
  0x19   :  { %522 = shalt.err (!%p519_p10)
}
  0x1a   :  { %s523_s24 = scalar_lea.vmem %s41_s16, 1024  ;;  %p528_p12 = scmp.lt.s32.totalorder %s41_s16, %s41_s16 }
  0x1b   :  { %p524_p11 = scmp.ne.s32.totalorder %s41_s16, %s523_s24  ;;  %p529_p13 = scmp.lt.s32.totalorder %s523_s24, %s523_s24 }
  0x1d   :  { %p530_p0 = por %p529_p13, %p528_p12 }
  0x1f   :  { %p531_p1 = pnand %p530_p0, %p524_p11 }
  0x21   :  { %534 = shalt.err (!%p531_p1)
}
  0x22   :  { %46 = dma.hbm_to_vmem [thread:$0]  %s691_s5, 1024, %s41_s16, [#allocation6], %s564_s11, %s564_s11, %s565_s12  }
  0x23   :  { %557 = dma.done.wait [#allocation3], 1024  }
  0x24   :  { %558 = vsyncadd [#allocation3], 4294966272 }
  0x25   :  { %559 = dma.done.wait [#allocation6], 1024  }
  0x26   :  { %560 = vsyncadd [#allocation6], 4294966272  ;;  %v567_v0 = vmov 0.0   ;;  %vm568_vm0 = vmmov 0   ;;  %vm75_vm1 = vcmask 1041408   ;;  %v474_v3 = vld [vmem:[%s686_s0] sm:$0xff]  }
  0x27   :  { %419 = vmatprep.subr.bf16.mxu0 %v567_v0  ;;  %421 = vmatprep.mubr.msk.bf16.mxu0 %vm568_vm0, %v567_v0  ;;  %v58_v1 = vld [vmem:[%s687_s1] sm:$0x3]  ;;  %vm71_vm2 = vcmask 31744   ;;  %v476_v5 = vld [vmem:[#allocation2 + $0x8] sm:$0xff]   ;;  %v477_v6 = vld [vmem:[#allocation2 + $0x10] sm:$0xff]   ;;  %s569_s9 = smov [#allocation7]  }
  0x28   :  { %425 = vmatprep.subr.bf16.mxu1 %v567_v0  ;;  %441 = vmatprep.mubr.msk.bf16.mxu1 %vm568_vm0, %v567_v0  ;;  %v77_v2 = vsel %vm75_vm1, %v58_v1, 0  ;;  %v475_v4 = vld [vmem:[#allocation2] sm:$0xff]   ;;  %v478_v7 = vld [vmem:[#allocation2 + $0x18] sm:$0xff]   ;;  %v480_v9 = vld [vmem:[#allocation2 + $0x28] sm:$0xff]  }
  0x29   :  { %420 = vmatpush3.bf16.msra.mxu0 %v77_v2  ;;  %426 = vmatpush3.bf16.msra.mxu1 %v475_v4  ;;  %v479_v8 = vld [vmem:[#allocation2 + $0x20] sm:$0xff]   ;;  %v481_v10 = vld [vmem:[#allocation2 + $0x30] sm:$0xff]   ;;  %v482_v11 = vld [vmem:[#allocation2 + $0x38] sm:$0xff]  }
  0x2a   :  { %445 = vmatprep.subr.bf16.mxu0 %v567_v0  ;;  %427 = vmatprep.subr.bf16.mxu1 %v567_v0  ;;  %v483_v12 = vld [vmem:[#allocation5] sm:$0xff]   ;;  %v484_v13 = vld [vmem:[#allocation5 + $0x8] sm:$0xff]   ;;  %v485_v14 = vld [vmem:[#allocation5 + $0x10] sm:$0xff]  }
  0x2b   :  { %v486_v15 = vld [vmem:[#allocation5 + $0x18] sm:$0xff]   ;;  %v487_v16 = vld [vmem:[#allocation5 + $0x20] sm:$0xff]   ;;  %v488_v17 = vld [vmem:[#allocation5 + $0x28] sm:$0xff]  }
  0x2c   :  { %422 = vmatmul.mubr.msk.bf16.vlgmr.msra.gmra.mrb[0].mxu0 %vm71_vm2, %v474_v3  ;;  %v378_v18 = vld [vmem:[%s688_s2] ss:$0 sm:$0xff]  ;;  %v489_v30 = vld [vmem:[#allocation5 + $0x30] sm:$0xff]   ;;  %v490_v31 = vld [vmem:[#allocation5 + $0x38] sm:$0xff]  }
  0x2d   :  { %461 = vmatprep.mubr.msk.bf16.mxu0 %vm568_vm0, %v567_v0  ;;  %428 = vmatpush3.bf16.msra.mxu1 %v476_v5  ;;  %v381_v32 = vld [vmem:[%s690_s4] ss:$0 sm:$0xff]  ;;  %s365_s4 = sshll.u32 %s569_s9, 4  ;;  %s366_s4 = int_to_ptr.vmem [resolvable:$true] %s365_s4 }
  0x2e   :  { %429 = vmatprep.subr.bf16.mxu1 %v567_v0  ;;  %446 = vmatpush3.bf16.msra.mxu0 %v483_v12  ;;  %v390_v44 = vld [vmem:[%s692_s6] ss:$0 sm:$0xff]  ;;  %s535_s10 = scalar_lea.vmem %s366_s4, 256  ;;  %p540_p3 = scmp.lt.s32.totalorder %s366_s4, %s366_s4 }
  0x2f   :  { %447 = vmatprep.subr.bf16.mxu0 %v567_v0  ;;  %p536_p2 = scmp.ne.s32.totalorder %s366_s4, %s535_s10  ;;  %p541_p4 = scmp.lt.s32.totalorder %s535_s10, %s535_s10 }
  0x31   :  { %430 = vmatpush3.bf16.msra.mxu1 %v477_v6  ;;  %p542_p5 = por %p541_p4, %p540_p3 }
  0x32   :  { %431 = vmatprep.subr.bf16.mxu1 %v567_v0  ;;  %448 = vmatpush3.bf16.msra.mxu0 %v484_v13 }
  0x33   :  { %449 = vmatprep.subr.bf16.mxu0 %v567_v0  ;;  %p543_p6 = pnand %p542_p5, %p536_p2 }
  0x35   :  { %432 = vmatpush3.bf16.msra.mxu1 %v478_v7 }
  0x36   :  { %433 = vmatprep.subr.bf16.mxu1 %v567_v0  ;;  %450 = vmatpush3.bf16.msra.mxu0 %v485_v14 }
  0x37   :  { %451 = vmatprep.subr.bf16.mxu0 %v567_v0 }
  0x39   :  { %434 = vmatpush3.bf16.msra.mxu1 %v479_v8 }
  0x3a   :  { %435 = vmatprep.subr.bf16.mxu1 %v567_v0  ;;  %452 = vmatpush3.bf16.msra.mxu0 %v486_v15 }
  0x3b   :  { %453 = vmatprep.subr.bf16.mxu0 %v567_v0 }
  0x3d   :  { %436 = vmatpush3.bf16.msra.mxu1 %v480_v9 }
  0x3e   :  { %437 = vmatprep.subr.bf16.mxu1 %v567_v0  ;;  %454 = vmatpush3.bf16.msra.mxu0 %v487_v16 }
  0x3f   :  { %455 = vmatprep.subr.bf16.mxu0 %v567_v0 }
  0x41   :  { %438 = vmatpush3.bf16.msra.mxu1 %v481_v10 }
  0x42   :  { %439 = vmatprep.subr.bf16.mxu1 %v567_v0  ;;  %456 = vmatpush3.bf16.msra.mxu0 %v488_v17 }
  0x43   :  { %457 = vmatprep.subr.bf16.mxu0 %v567_v0 }
  0x45   :  { %440 = vmatpush3.bf16.msra.mxu1 %v482_v11 }
  0x46   :  { %458 = vmatpush3.bf16.msra.mxu0 %v489_v30 }
  0x47   :  { %459 = vmatprep.subr.bf16.mxu0 %v567_v0 }
  0x4a   :  { %460 = vmatpush3.bf16.msra.mxu0 %v490_v31 }
  0xff   :  { %v113_v19 = vpop.f32.mrb[0].mxu0 }
 0x100   :  { %v114_v20 = vadd.f32 %v378_v18, %v113_v19  ;;  %v423_v21 = vpop.f32.mrb[1].mxu0 }
 0x101   :  { %v116_v22 = vpop.f32.mrb[2].mxu0 }
 0x102   :  { %v122_v23 = vmul.f32 0.01, %v114_v20  ;;  %v117_v24 = vadd.f32 %v378_v18, %v116_v22  ;;  %v424_v25 = vpop.f32.mrb[3].mxu0  ;;  %vm120_vm3 = vcmp.gt.f32.partialorder %v114_v20, 0.0 }
 0x104   :  { %vm121_vm4 = vcmp.gt.f32.partialorder %v117_v24, 0.0  ;;  %v123_v26 = vmul.f32 0.01, %v117_v24  ;;  %v124_v27 = vsel %vm120_vm3, %v114_v20, %v122_v23 }
 0x106   :  { %v125_v28 = vsel %vm121_vm4, %v117_v24, %v123_v26 }
 0x107   :  { %v126_v29 = vpack.c.bf16 %v125_v28, %v124_v27 }
 0x109   :  { %442 = vmatmul.mubr.bf16.vlgmr.msra.gmra.mrb[0].mxu1 %v126_v29 }
 0x1dc   :  { %v232_v33 = vpop.f32.mrb[0].mxu1 }
 0x1dd   :  { %v233_v34 = vadd.f32 %v381_v32, %v232_v33  ;;  %v443_v35 = vpop.f32.mrb[1].mxu1 }
 0x1de   :  { %v235_v36 = vpop.f32.mrb[2].mxu1 }
 0x1df   :  { %v241_v37 = vmul.f32 0.01, %v233_v34  ;;  %v236_v38 = vadd.f32 %v381_v32, %v235_v36  ;;  %v444_v39 = vpop.f32.mrb[3].mxu1  ;;  %vm239_vm5 = vcmp.gt.f32.partialorder %v233_v34, 0.0 }
 0x1e1   :  { %vm240_vm6 = vcmp.gt.f32.partialorder %v236_v38, 0.0  ;;  %v242_v40 = vmul.f32 0.01, %v236_v38  ;;  %v243_v41 = vsel %vm239_vm5, %v233_v34, %v241_v37 }
 0x1e3   :  { %v244_v42 = vsel %vm240_vm6, %v236_v38, %v242_v40 }
 0x1e4   :  { %v245_v43 = vpack.c.bf16 %v244_v42, %v243_v41 }
 0x1e6   :  { %462 = vmatmul.mubr.bf16.vlgmr.msra.gmra.mrb[4].mxu0 %v245_v43 }
 0x2b9   :  { %v351_v45 = vpop.f32.mrb[4].mxu0 }
 0x2ba   :  { %v352_v46 = vadd.f32 %v390_v44, %v351_v45  ;;  %v463_v47 = vpop.f32.mrb[5].mxu0 }
 0x2bb   :  { %v354_v48 = vpop.f32.mrb[6].mxu0 }
 0x2bc   :  { %358 = vst [vmem:[#allocation7] sm:$0xff] %v352_v46  ;;  %v355_v49 = vadd.f32 %v390_v44, %v354_v48  ;;  %v464_v50 = vpop.f32.mrb[7].mxu0 }
 0x2be   :  { %359 = vst [vmem:[#allocation7 + $0x8] sm:$0xff] %v355_v49 }
 0x2bf   :  { %546 = shalt.err (!%p543_p6)
}
 0x2c0   :  { %s547_s12 = scalar_lea.hbm %s693_s7, 256 }
 0x2c1   :  { %p548_p7 = scmp.ne.s32.totalorder %s693_s7, %s547_s12  ;;  %p551_p8 = scmp.lt.u32.totalorder %s547_s12, %s693_s7 }
 0x2c3   :  { %p553_p9 = pnand %p551_p8, %p548_p7 }
 0x2c5   :  { %556 = shalt.err (!%p553_p9)
}
 0x2c6   :  { %s570_s17 = smov 128   ;;  %s571_s18 = smov 8  }
 0x2c7   :  { %371 = dma.vmem_to_hbm [thread:$0]  %s366_s4, 256, %s693_s7, [#allocation4], %s570_s17, %s570_s17, %s571_s18  }
 0x2c8   :  { %561 = dma.done.wait [#allocation4], 256  }
 0x2c9   :  { %562 = vsyncadd [#allocation4], 4294967040 }
 0x2ca   :  { %375 = vsyncpa [#allocation3], 1 }
 0x2cb   :  { %376 = vsyncpa [#allocation6], 1 }
 0x2cc   :  { %377 = vsyncpa [#allocation4], 1 }

</bundles_post_ra>
